<compile_context>
chip_gen: v7x
topology: tpu7x:2x2x1
jax: 0.10.0
libtpu: 0.0.40
codegen_flags: <defaults>
</compile_context>

<pallas_src>
import jax
import jax.numpy as jnp
from jax.experimental import pallas as pl
from jax.experimental.pallas import tpu as pltpu


def _round_up(n, m):
    return ((n + m - 1) // m) * m


def _mlp_kernel(x_ref, w1_ref, wh_ref, b_ref, wo_ref, bo_ref, out_ref):
    # Layer 1: (tm, F) @ (F, H) on the MXU.
    h = jnp.dot(x_ref[...], w1_ref[...], preferred_element_type=jnp.float32)
    h = jnp.maximum(h + b_ref[0:1, :], 0.0)

    # Layers 2..5: statically unrolled, weights resident in VMEM.
    for i in range(wh_ref.shape[0]):
        h = jnp.dot(h, wh_ref[i], preferred_element_type=jnp.float32)
        h = jnp.maximum(h + b_ref[i + 1:i + 2, :], 0.0)

    # Output layer (H -> 1): broadcast-mul + lane reduce on the VPU/XLU
    # instead of an MXU push/pop for a 32x1 matvec.
    y = jnp.sum(h * wo_ref[...], axis=-1, keepdims=True) + bo_ref[...]
    out_ref[...] = y.astype(out_ref.dtype)


def rnn2_forward(x, params, block_rows=512):
    """params: list of 6 (W, b) pairs; W is (in, out), b is (1, out).

    All hidden layers must share the same width (true for the RNN2 config
    used here: n_l1..n_l5 == 32) so their weights can be stacked.
    """
    batch, n_feature = x.shape
    (w1, b1), *hidden, (wo, bo) = params
    h_dim = w1.shape[1]
    for w, _ in hidden:
        assert w.shape == (h_dim, h_dim), "hidden layers must be square/equal width"
    assert wo.shape == (h_dim, 1)

    # Pack operands: 13 arrays -> 6 (fewer DMA descriptors / semaphores).
    wh = jnp.stack([w for w, _ in hidden], axis=0)                  # (4, H, H)
    b_all = jnp.concatenate([b1] + [b for _, b in hidden], axis=0)  # (5, H)
    wo_row = wo.reshape(1, h_dim)                                   # (1, H)
    bo = bo.reshape(1, 1)                                           # (1, 1)

    # Batch tile: multiple of 8 sublanes (f32); pad the batch up to a tile
    # multiple and slice the result back afterwards.
    tm = min(block_rows, _round_up(batch, 8))
    padded = _round_up(batch, tm)
    x_p = jnp.pad(x, ((0, padded - batch), (0, 0))) if padded != batch else x
    grid = (padded // tm,)
    n_hidden = wh.shape[0]

    cost = pl.CostEstimate(
        flops=2 * padded * (n_feature * h_dim + n_hidden * h_dim * h_dim + h_dim),
        transcendentals=0,
        bytes_accessed=(padded * n_feature * 4
                        + (w1.size + wh.size + b_all.size + wo_row.size + bo.size) * 4
                        + padded * 4),
    )

    out = pl.pallas_call(
        _mlp_kernel,
        out_shape=jax.ShapeDtypeStruct((padded, 1), jnp.float32),
        grid=grid,
        in_specs=[
            # x: tiled along batch, auto double-buffered.
            pl.BlockSpec((tm, n_feature), lambda i: (i, 0)),
            # weights / biases: constant block index -> one HBM->VMEM DMA,
            # resident across all batch tiles.
            pl.BlockSpec((n_feature, h_dim), lambda i: (0, 0)),
            pl.BlockSpec((n_hidden, h_dim, h_dim), lambda i: (0, 0, 0)),
            pl.BlockSpec((n_hidden + 1, h_dim), lambda i: (0, 0)),
            pl.BlockSpec((1, h_dim), lambda i: (0, 0)),
            pl.BlockSpec((1, 1), lambda i: (0, 0)),
        ],
        out_specs=pl.BlockSpec((tm, 1), lambda i: (i, 0)),
        compiler_params=pltpu.CompilerParams(
            dimension_semantics=("parallel",)),  # shards across v7x's 2 TCs
        cost_estimate=cost,
    )(x_p, w1, wh, b_all, wo_row, bo)

    return out[:batch] if padded != batch else out


def init_params(key, n_feature, layer_sizes):
    """Deterministic init mimicking nn.Linear's U(-1/sqrt(in), 1/sqrt(in))."""
    params = []
    dims = [n_feature] + list(layer_sizes)
    for i in range(len(dims) - 1):
        fan_in, fan_out = dims[i], dims[i + 1]
        key, kw, kb = jax.random.split(key, 3)
        bound = 1.0 / jnp.sqrt(jnp.float32(fan_in))
        w = jax.random.uniform(kw, (fan_in, fan_out), jnp.float32,
                               minval=-bound, maxval=bound)
        b = jax.random.uniform(kb, (1, fan_out), jnp.float32,
                               minval=-bound, maxval=bound)
        params.append((w, b))
    return params


if __name__ == "__main__":
    key = jax.random.PRNGKey(0)
    k_x, k_p = jax.random.split(key)

    n_feature = 67
    n_l1 = n_l2 = n_l3 = n_l4 = n_l5 = 32
    batch = 8

    x = jax.random.normal(k_x, (batch, n_feature), jnp.float32)
    params = init_params(k_p, n_feature, (n_l1, n_l2, n_l3, n_l4, n_l5, 1))

    out = rnn2_forward(x, params)
    out = jax.block_until_ready(out)

    # Pure-JAX reference of the fused kernel (same f32 math).
    ref = x
    for i, (w, b) in enumerate(params):
        ref = ref @ w + b
        if i < len(params) - 1:
            ref = jnp.maximum(ref, 0.0)

    assert out.shape == (batch, 1)
    assert jnp.allclose(out, ref, atol=1e-5, rtol=1e-5)

    print("KERNEL_OK")
</pallas_src>

<mosaic_0001>
module attributes {stable_mosaic.version = 11 : i64} {
  func.func @_mlp_kernel(%arg0: i32, %arg1: memref<8x67xf32, #tpu.memory_space<vmem>>, %arg2: memref<67x32xf32, #tpu.memory_space<vmem>>, %arg3: memref<4x32x32xf32, #tpu.memory_space<vmem>>, %arg4: memref<5x32xf32, #tpu.memory_space<vmem>>, %arg5: memref<1x32xf32, #tpu.memory_space<vmem>>, %arg6: memref<1x1xf32, #tpu.memory_space<vmem>>, %arg7: memref<8x1xf32, #tpu.memory_space<vmem>>) attributes {dimension_semantics = [#tpu.dimension_semantics<parallel>], iteration_bounds = array<i64: 1>, scalar_prefetch = 0 : i64, scratch_operands = 0 : i64, tpu.core_type = #tpu.core_type<tc>, window_params = [{transform_indices = @transform_0, window_bounds = array<i64: 8, 67>}, {pipeline_mode = #tpu.pipeline_mode<synchronous>, transform_indices = @transform_1, window_bounds = array<i64: 67, 32>}, {pipeline_mode = #tpu.pipeline_mode<synchronous>, transform_indices = @transform_2, window_bounds = array<i64: 4, 32, 32>}, {pipeline_mode = #tpu.pipeline_mode<synchronous>, transform_indices = @transform_3, window_bounds = array<i64: 5, 32>}, {pipeline_mode = #tpu.pipeline_mode<synchronous>, transform_indices = @transform_4, window_bounds = array<i64: 1, 32>}, {pipeline_mode = #tpu.pipeline_mode<synchronous>, transform_indices = @transform_5, window_bounds = array<i64: 1, 1>}, {transform_indices = @transform_6, window_bounds = array<i64: 8, 1>}]} {
    %c0 = arith.constant 0 : index
    %c0_0 = arith.constant 0 : index
    %0 = vector.load %arg1[%c0, %c0_0] : memref<8x67xf32, #tpu.memory_space<vmem>>, vector<8x67xf32>
    %c0_1 = arith.constant 0 : index
    %c0_2 = arith.constant 0 : index
    %1 = vector.load %arg2[%c0_1, %c0_2] : memref<67x32xf32, #tpu.memory_space<vmem>>, vector<67x32xf32>
    %cst = arith.constant dense<0.000000e+00> : vector<8x32xf32>
    %2 = tpu.matmul %0, %1, %cst {dimension_numbers = #tpu.dot_dimension_numbers<[1], [0], [0], [1], [0, 0, 1, 1], [], []>} : vector<8x67xf32>, vector<67x32xf32>, vector<8x32xf32> -> vector<8x32xf32>
    %c0_3 = arith.constant 0 : index
    %c0_4 = arith.constant 0 : index
    %3 = vector.load %arg4[%c0_3, %c0_4] : memref<5x32xf32, #tpu.memory_space<vmem>>, vector<1x32xf32>
    %4 = vector.broadcast %3 : vector<1x32xf32> to vector<8x32xf32>
    %5 = arith.addf %2, %4 : vector<8x32xf32>
    %cst_5 = arith.constant 0.000000e+00 : f32
    %6 = vector.broadcast %cst_5 : f32 to vector<8x32xf32>
    %7 = arith.maximumf %5, %6 : vector<8x32xf32>
    %c0_6 = arith.constant 0 : index
    %c0_7 = arith.constant 0 : index
    %c0_8 = arith.constant 0 : index
    %8 = vector.load %arg3[%c0_6, %c0_7, %c0_8] : memref<4x32x32xf32, #tpu.memory_space<vmem>>, vector<1x32x32xf32>
    %9 = vector.shape_cast %8 : vector<1x32x32xf32> to vector<32x32xf32>
    %cst_9 = arith.constant dense<0.000000e+00> : vector<8x32xf32>
    %10 = tpu.matmul %7, %9, %cst_9 {dimension_numbers = #tpu.dot_dimension_numbers<[1], [0], [0], [1], [0, 0, 1, 1], [], []>} : vector<8x32xf32>, vector<32x32xf32>, vector<8x32xf32> -> vector<8x32xf32>
    %c1 = arith.constant 1 : index
    %c0_10 = arith.constant 0 : index
    %11 = vector.load %arg4[%c1, %c0_10] : memref<5x32xf32, #tpu.memory_space<vmem>>, vector<1x32xf32>
    %12 = vector.broadcast %11 : vector<1x32xf32> to vector<8x32xf32>
    %13 = arith.addf %10, %12 : vector<8x32xf32>
    %cst_11 = arith.constant 0.000000e+00 : f32
    %14 = vector.broadcast %cst_11 : f32 to vector<8x32xf32>
    %15 = arith.maximumf %13, %14 : vector<8x32xf32>
    %c1_12 = arith.constant 1 : index
    %c0_13 = arith.constant 0 : index
    %c0_14 = arith.constant 0 : index
    %16 = vector.load %arg3[%c1_12, %c0_13, %c0_14] : memref<4x32x32xf32, #tpu.memory_space<vmem>>, vector<1x32x32xf32>
    %17 = vector.shape_cast %16 : vector<1x32x32xf32> to vector<32x32xf32>
    %cst_15 = arith.constant dense<0.000000e+00> : vector<8x32xf32>
    %18 = tpu.matmul %15, %17, %cst_15 {dimension_numbers = #tpu.dot_dimension_numbers<[1], [0], [0], [1], [0, 0, 1, 1], [], []>} : vector<8x32xf32>, vector<32x32xf32>, vector<8x32xf32> -> vector<8x32xf32>
    %c2 = arith.constant 2 : index
    %c0_16 = arith.constant 0 : index
    %19 = vector.load %arg4[%c2, %c0_16] : memref<5x32xf32, #tpu.memory_space<vmem>>, vector<1x32xf32>
    %20 = vector.broadcast %19 : vector<1x32xf32> to vector<8x32xf32>
    %21 = arith.addf %18, %20 : vector<8x32xf32>
    %cst_17 = arith.constant 0.000000e+00 : f32
    %22 = vector.broadcast %cst_17 : f32 to vector<8x32xf32>
    %23 = arith.maximumf %21, %22 : vector<8x32xf32>
    %c2_18 = arith.constant 2 : index
    %c0_19 = arith.constant 0 : index
    %c0_20 = arith.constant 0 : index
    %24 = vector.load %arg3[%c2_18, %c0_19, %c0_20] : memref<4x32x32xf32, #tpu.memory_space<vmem>>, vector<1x32x32xf32>
    %25 = vector.shape_cast %24 : vector<1x32x32xf32> to vector<32x32xf32>
    %cst_21 = arith.constant dense<0.000000e+00> : vector<8x32xf32>
    %26 = tpu.matmul %23, %25, %cst_21 {dimension_numbers = #tpu.dot_dimension_numbers<[1], [0], [0], [1], [0, 0, 1, 1], [], []>} : vector<8x32xf32>, vector<32x32xf32>, vector<8x32xf32> -> vector<8x32xf32>
    %c3 = arith.constant 3 : index
    %c0_22 = arith.constant 0 : index
    %27 = vector.load %arg4[%c3, %c0_22] : memref<5x32xf32, #tpu.memory_space<vmem>>, vector<1x32xf32>
    %28 = vector.broadcast %27 : vector<1x32xf32> to vector<8x32xf32>
    %29 = arith.addf %26, %28 : vector<8x32xf32>
    %cst_23 = arith.constant 0.000000e+00 : f32
    %30 = vector.broadcast %cst_23 : f32 to vector<8x32xf32>
    %31 = arith.maximumf %29, %30 : vector<8x32xf32>
    %c3_24 = arith.constant 3 : index
    %c0_25 = arith.constant 0 : index
    %c0_26 = arith.constant 0 : index
    %32 = vector.load %arg3[%c3_24, %c0_25, %c0_26] : memref<4x32x32xf32, #tpu.memory_space<vmem>>, vector<1x32x32xf32>
    %33 = vector.shape_cast %32 : vector<1x32x32xf32> to vector<32x32xf32>
    %cst_27 = arith.constant dense<0.000000e+00> : vector<8x32xf32>
    %34 = tpu.matmul %31, %33, %cst_27 {dimension_numbers = #tpu.dot_dimension_numbers<[1], [0], [0], [1], [0, 0, 1, 1], [], []>} : vector<8x32xf32>, vector<32x32xf32>, vector<8x32xf32> -> vector<8x32xf32>
    %c4 = arith.constant 4 : index
    %c0_28 = arith.constant 0 : index
    %35 = vector.load %arg4[%c4, %c0_28] : memref<5x32xf32, #tpu.memory_space<vmem>>, vector<1x32xf32>
    %36 = vector.broadcast %35 : vector<1x32xf32> to vector<8x32xf32>
    %37 = arith.addf %34, %36 : vector<8x32xf32>
    %cst_29 = arith.constant 0.000000e+00 : f32
    %38 = vector.broadcast %cst_29 : f32 to vector<8x32xf32>
    %39 = arith.maximumf %37, %38 : vector<8x32xf32>
    %c0_30 = arith.constant 0 : index
    %c0_31 = arith.constant 0 : index
    %40 = vector.load %arg5[%c0_30, %c0_31] : memref<1x32xf32, #tpu.memory_space<vmem>>, vector<1x32xf32>
    %41 = vector.broadcast %40 : vector<1x32xf32> to vector<8x32xf32>
    %42 = arith.mulf %39, %41 : vector<8x32xf32>
    %cst_32 = arith.constant dense<0.000000e+00> : vector<8xf32>
    %43 = vector.multi_reduction <add>, %42, %cst_32 [1] : vector<8x32xf32> to vector<8xf32>
    %44 = vector.shape_cast %43 : vector<8xf32> to vector<8x1xf32>
    %c0_33 = arith.constant 0 : index
    %c0_34 = arith.constant 0 : index
    %45 = vector.load %arg6[%c0_33, %c0_34] : memref<1x1xf32, #tpu.memory_space<vmem>>, vector<1x1xf32>
    %46 = vector.broadcast %45 : vector<1x1xf32> to vector<8x1xf32>
    %47 = arith.addf %44, %46 : vector<8x1xf32>
    %c0_35 = arith.constant 0 : index
    %c0_36 = arith.constant 0 : index
    %48 = vector.load %arg7[%c0_35, %c0_36] : memref<8x1xf32, #tpu.memory_space<vmem>>, vector<8x1xf32>
    tpu.vector_store %arg7[%c0_35, %c0_36], %47 {strides = array<i32>} : memref<8x1xf32, #tpu.memory_space<vmem>>, vector<8x1xf32>,
    return
  }
  func.func @transform_0(%arg0: i32) -> (i32, i32) {
    %c0_i32 = arith.constant 0 : i32
    %c0_i32_0 = arith.constant 0 : i32
    return %arg0, %c0_i32 : i32, i32
  }
  func.func @transform_1(%arg0: i32) -> (i32, i32) {
    %c0_i32 = arith.constant 0 : i32
    %c0_i32_0 = arith.constant 0 : i32
    %c0_i32_1 = arith.constant 0 : i32
    return %c0_i32, %c0_i32_0 : i32, i32
  }
  func.func @transform_2(%arg0: i32) -> (i32, i32, i32) {
    %c0_i32 = arith.constant 0 : i32
    %c0_i32_0 = arith.constant 0 : i32
    %c0_i32_1 = arith.constant 0 : i32
    %c0_i32_2 = arith.constant 0 : i32
    return %c0_i32, %c0_i32_0, %c0_i32_1 : i32, i32, i32
  }
  func.func @transform_3(%arg0: i32) -> (i32, i32) {
    %c0_i32 = arith.constant 0 : i32
    %c0_i32_0 = arith.constant 0 : i32
    %c0_i32_1 = arith.constant 0 : i32
    return %c0_i32, %c0_i32_0 : i32, i32
  }
  func.func @transform_4(%arg0: i32) -> (i32, i32) {
    %c0_i32 = arith.constant 0 : i32
    %c0_i32_0 = arith.constant 0 : i32
    %c0_i32_1 = arith.constant 0 : i32
    return %c0_i32, %c0_i32_0 : i32, i32
  }
  func.func @transform_5(%arg0: i32) -> (i32, i32) {
    %c0_i32 = arith.constant 0 : i32
    %c0_i32_0 = arith.constant 0 : i32
    %c0_i32_1 = arith.constant 0 : i32
    return %c0_i32, %c0_i32_0 : i32, i32
  }
  func.func @transform_6(%arg0: i32) -> (i32, i32) {
    %c0_i32 = arith.constant 0 : i32
    %c0_i32_0 = arith.constant 0 : i32
    return %arg0, %c0_i32 : i32, i32
  }
}

</mosaic_0001>

<bundles_post_ra>
// kernel: tpu_custom_call.1
= control target key start
LH: loop header
LB: loop body
LE: loop exit
PB: predicated region body
PF: predicated region fallthrough
CT: control target
= control target key end

     0   :  { %s804_s0 = inlined_call_operand.vmem [shape: f32[8,67], index: 0, kind: input, shape index: {}]   ;;  %s805_s1 = inlined_call_operand.vmem [shape: f32[67,32], index: 1, kind: input, shape index: {}]   ;;  %s806_s2 = inlined_call_operand.hbm [shape: f32[4,32,32], index: 2, kind: input, shape index: {}]   ;;  %s807_s3 = inlined_call_operand.vmem [shape: f32[5,32], index: 3, kind: input, shape index: {}]   ;;  %s808_s4 = inlined_call_operand.vmem [shape: f32[1,32], index: 4, kind: input, shape index: {}]   ;;  %s809_s5 = inlined_call_operand.<no memory space> [shape: f32[1,1], index: 5, kind: input, shape index: {}]   ;;  %s810_s6 = inlined_call_operand.vmem [shape: f32[8,1], index: 6, kind: output, shape index: {}]  }
   0x1   :  { %v11_v0 = vstv %s809_s5 }
   0x2   :  { %12 = vst [vmem:[#allocation2] sm:$0x1] %v11_v0 }
   0x3   :  { %13 = vsyncpa [#allocation4], 0  ;;  %s669_s23 = smov [#allocation3]   ;;  %s645_s27 = scalar_lea.hbm %s806_s2, 2048 }
   0x4   :  { %s23_s24 = sshll.u32 %s669_s23, 4  ;;  %p646_p0 = scmp.ne.s32.totalorder %s806_s2, %s645_s27  ;;  %s24_s24 = int_to_ptr.vmem [resolvable:$true] %s23_s24 }
   0x5   :  { %p649_p1 = scmp.lt.u32.totalorder %s645_s27, %s806_s2 }
   0x7   :  { %p651_p2 = pnand %p649_p1, %p646_p0 }
   0x9   :  { %654 = shalt.err (!%p651_p2)
}
   0xa   :  { %s655_s5 = scalar_lea.vmem %s24_s24, 2048  ;;  %p660_p4 = scmp.lt.s32.totalorder %s24_s24, %s24_s24 }
   0xb   :  { %p656_p3 = scmp.ne.s32.totalorder %s24_s24, %s655_s5  ;;  %p661_p5 = scmp.lt.s32.totalorder %s655_s5, %s655_s5 }
   0xd   :  { %p662_p6 = por %p661_p5, %p660_p4 }
   0xf   :  { %p663_p7 = pnand %p662_p6, %p656_p3 }
  0x11   :  { %666 = shalt.err (!%p663_p7)
}
  0x12   :  { %s670_s8 = smov 128   ;;  %s671_s9 = smov 8  }
  0x13   :  { %29 = dma.hbm_to_vmem [thread:$0]  %s806_s2, 2048, %s24_s24, [#allocation4], %s670_s8, %s670_s8, %s671_s9  }
  0x14   :  { %667 = dma.done.wait [#allocation4], 2048  }
  0x15   :  { %668 = vsyncadd [#allocation4], 4294965248  ;;  %v672_v1 = vmov 0.0|0.0   ;;  %vm673_vm0 = vmmov 0   ;;  %v674_v2 = vmov 0.0   ;;  %v40_v3 = vld [vmem:[%s805_s1] sm:$0xff] }
  0x16   :  { %603 = vmatprep.subr.bf16.mxu0 %v672_v1  ;;  %556 = vmatprep.mubr.msk.f32.mxu0 %vm673_vm0, %v674_v2  ;;  %v41_v4 = vld [vmem:[%s805_s1 + $0x8] sm:$0xff]  ;;  %v42_v5 = vld [vmem:[%s805_s1 + $0x10] sm:$0xff]  ;;  %v43_v7 = vld [vmem:[%s805_s1 + $0x18] sm:$0xff]  ;;  %vm58_vm1 = vcmask 1042432   ;;  %vm54_vm2 = vcmask 547840   ;;  %vm142_vm3 = vcmask 261120  }
  0x17   :  { %615 = vmatprep.subr.bf16.mxu1 %v672_v1  ;;  %567 = vmatprep.mubr.msk.f32.mxu1 %vm673_vm0, %v674_v2  ;;  %v604_v6 = vpack.c.bf16 %v41_v4, %v40_v3  ;;  %v607_v8 = vpack.c.bf16 %v43_v7, %v42_v5  ;;  %v133_v9 = vld [vmem:[#allocation3] sm:$0xff]  ;;  %v134_v10 = vld [vmem:[#allocation3 + $0x8] sm:$0xff]  ;;  %v47_v16 = vld [vmem:[%s805_s1 + $0x38] sm:$0xff]  ;;  %vm488_vm4 = vcmask 7168  }
  0x18   :  { %v44_v11 = vld [vmem:[%s805_s1 + $0x20] sm:$0xff]  ;;  %v45_v12 = vld [vmem:[%s805_s1 + $0x28] sm:$0xff]  ;;  %v616_v13 = vpack.c.bf16 %v134_v10, %v133_v9  ;;  %v46_v15 = vld [vmem:[%s805_s1 + $0x30] sm:$0xff] }
  0x19   :  { %605 = vmatpush3.bf16.msra.mxu0 %v604_v6  ;;  %v610_v14 = vpack.c.bf16 %v45_v12, %v44_v11  ;;  %v613_v17 = vpack.c.bf16 %v47_v16, %v46_v15  ;;  %v48_v18 = vld [vmem:[%s805_s1 + $0x40] sm:$0x7]  ;;  %v135_v20 = vld [vmem:[#allocation3 + $0x10] sm:$0xff]  ;;  %v219_v25 = vld [vmem:[#allocation3 + $0x28] sm:$0xff] }
  0x1a   :  { %606 = vmatprep.subr.bf16.mxu0 %v672_v1  ;;  %617 = vmatpush3.bf16.msra.mxu1 %v616_v13  ;;  %v39_v19 = vld [vmem:[%s804_s0] sm:$0xff]  ;;  %v220_v31 = vld [vmem:[#allocation3 + $0x30] sm:$0xff]  ;;  %v303_v36 = vld [vmem:[#allocation3 + $0x48] sm:$0xff] }
  0x1b   :  { %618 = vmatprep.subr.bf16.mxu1 %v672_v1  ;;  %v136_v21 = vld [vmem:[#allocation3 + $0x18] sm:$0xff]  ;;  %v218_v24 = vld [vmem:[#allocation3 + $0x20] sm:$0xff]  ;;  %v304_v42 = vld [vmem:[#allocation3 + $0x50] sm:$0xff] }
  0x1c   :  { %v619_v22 = vpack.c.bf16 %v136_v21, %v135_v20  ;;  %v495_v23 = vld [vmem:[%s807_s3] ss:$0 sm:$0xff]  ;;  %v622_v29 = vpack.c.bf16 %v219_v25, %v218_v24  ;;  %v498_v34 = vld [vmem:[%s807_s3 + $0x1] ss:$0 sm:$0xff]  ;;  %v387_v46 = vld [vmem:[#allocation3 + $0x68] sm:$0xff] }
  0x1d   :  { %608 = vmatpush3.bf16.msra.mxu0 %v607_v8  ;;  %v221_v32 = vld [vmem:[#allocation3 + $0x38] sm:$0xff]  ;;  %v302_v35 = vld [vmem:[#allocation3 + $0x40] sm:$0xff]  ;;  %v388_v53 = vld [vmem:[#allocation3 + $0x70] sm:$0xff] }
  0x1e   :  { %609 = vmatprep.subr.bf16.mxu0 %v672_v1  ;;  %620 = vmatpush3.bf16.msra.mxu1 %v619_v22  ;;  %v625_v33 = vpack.c.bf16 %v221_v32, %v220_v31  ;;  %v628_v40 = vpack.c.bf16 %v303_v36, %v302_v35  ;;  %v305_v43 = vld [vmem:[#allocation3 + $0x58] sm:$0xff]  ;;  %v386_v45 = vld [vmem:[#allocation3 + $0x60] sm:$0xff] }
  0x1f   :  { %621 = vmatprep.subr.bf16.mxu1 %v672_v1  ;;  %v631_v44 = vpack.c.bf16 %v305_v43, %v304_v42  ;;  %v634_v47 = vpack.c.bf16 %v387_v46, %v386_v45  ;;  %v500_v48 = vld [vmem:[%s807_s3 + $0x2] ss:$0 sm:$0xff]  ;;  %v389_v54 = vld [vmem:[#allocation3 + $0x78] sm:$0xff]  ;;  %v502_v56 = vld [vmem:[%s807_s3 + $0x3] ss:$0 sm:$0xff] }
  0x20   :  { %v637_v55 = vpack.c.bf16 %v389_v54, %v388_v53  ;;  %v504_v61 = vld [vmem:[%s807_s3 + $0x4] ss:$0 sm:$0xff]  ;;  %v507_v5 = vld [vmem:[#allocation2] ss:$0 sm:$0xff] }
  0x21   :  { %611 = vmatpush3.bf16.msra.mxu0 %v610_v14 }
  0x22   :  { %612 = vmatprep.subr.bf16.mxu0 %v672_v1 }
  0x25   :  { %614 = vmatpush3.bf16.msra.mxu0 %v613_v17 }
  0x26   :  { %554 = vmatprep.subr.mxu0 %v674_v2 }
  0x29   :  { %555 = vmatpush3.msk.msra.mxu0 %vm58_vm1, %v48_v18 }
  0x2a   :  { %557 = vmatmul.mubr.msk.f32.vlgmr.msra.gmra.mrb[0].mxu0 %vm54_vm2, %v39_v19  ;;  %633 = vmatprep.subr.bf16.mxu0 %v672_v1 }
  0x2b   :  { %600 = vmatprep.mubr.msk.f32.mxu0 %vm673_vm0, %v674_v2  ;;  %635 = vmatpush3.bf16.msra.mxu0 %v634_v47 }
  0x2c   :  { %636 = vmatprep.subr.bf16.mxu0 %v672_v1 }
  0x2f   :  { %638 = vmatpush3.bf16.msra.mxu0 %v637_v55 }
  0xfd   :  { %v128_v26 = vpop.f32.mrb[0].mxu0 }
  0xfe   :  { %v129_v27 = vadd.f32 %v495_v23, %v128_v26  ;;  %v558_v28 = vpop.f32.mrb[1].mxu0 }
 0x100   :  { %v132_v30 = vmax.f32 %v129_v27, 0.0 }
 0x102   :  { %568 = vmatmul.mubr.msk.f32.vlgmr.msra.gmra.mrb[0].mxu1 %vm142_vm3, %v132_v30 }
 0x103   :  { %623 = vmatpush3.bf16.msra.mxu1 %v622_v29  ;;  %578 = vmatprep.mubr.msk.f32.mxu1 %vm673_vm0, %v674_v2 }
 0x104   :  { %624 = vmatprep.subr.bf16.mxu1 %v672_v1 }
 0x107   :  { %626 = vmatpush3.bf16.msra.mxu1 %v625_v33 }
 0x108   :  { %627 = vmatprep.subr.bf16.mxu1 %v672_v1 }
 0x1d5   :  { %v212_v37 = vpop.f32.mrb[0].mxu1 }
 0x1d6   :  { %v213_v38 = vadd.f32 %v498_v34, %v212_v37  ;;  %v569_v39 = vpop.f32.mrb[1].mxu1 }
 0x1d8   :  { %v216_v41 = vmax.f32 %v213_v38, 0.0 }
 0x1da   :  { %579 = vmatmul.mubr.msk.f32.vlgmr.msra.gmra.mrb[2].mxu1 %vm142_vm3, %v216_v41 }
 0x1db   :  { %629 = vmatpush3.bf16.msra.mxu1 %v628_v40  ;;  %589 = vmatprep.mubr.msk.f32.mxu1 %vm673_vm0, %v674_v2 }
 0x1dc   :  { %630 = vmatprep.subr.bf16.mxu1 %v672_v1  ;;  %v506_v1 = vld [vmem:[%s808_s4] ss:$0 sm:$0xff] }
 0x1df   :  { %632 = vmatpush3.bf16.msra.mxu1 %v631_v44 }
 0x2ad   :  { %v296_v49 = vpop.f32.mrb[2].mxu1 }
 0x2ae   :  { %v297_v50 = vadd.f32 %v500_v48, %v296_v49  ;;  %v580_v51 = vpop.f32.mrb[3].mxu1 }
 0x2b0   :  { %v300_v52 = vmax.f32 %v297_v50, 0.0 }
 0x2b2   :  { %590 = vmatmul.mubr.msk.f32.vlgmr.msra.gmra.mrb[4].mxu1 %vm142_vm3, %v300_v52 }
 0x385   :  { %v380_v57 = vpop.f32.mrb[4].mxu1 }
 0x386   :  { %v381_v58 = vadd.f32 %v502_v56, %v380_v57  ;;  %v591_v59 = vpop.f32.mrb[5].mxu1 }
 0x388   :  { %v384_v60 = vmax.f32 %v381_v58, 0.0 }
 0x38a   :  { %601 = vmatmul.mubr.msk.f32.vlgmr.msra.gmra.mrb[2].mxu0 %vm142_vm3, %v384_v60 }
 0x45d   :  { %v464_v62 = vpop.f32.mrb[2].mxu0 }
 0x45e   :  { %v465_v63 = vadd.f32 %v504_v61, %v464_v62  ;;  %v602_v0 = vpop.f32.mrb[3].mxu0 }
 0x460   :  { %v468_v2 = vmax.f32 %v465_v63, 0.0 }
 0x462   :  { %v476_v3 = vmul.f32 %v506_v1, %v468_v2 }
 0x464   :  { %v477_v4 = vsel %vm142_vm3, %v476_v3, 0.0 }
 0x465   :  { %478 = vadd.xlane.f32.xlu0 %v477_v4 }
 0x4f2   :  { %v479_v6 = vpop.xlane.xlu0 %478 }
 0x4f3   :  { %v487_v7 = vadd.f32 %v507_v5, %v479_v6 }
 0x4f5   :  { %489 = vst.msk [vmem:[%s810_s6] sm:$0xff] %vm488_vm4, %v487_v7 }
 0x4f6   :  { %494 = vsyncpa [#allocation4], 1 }

</bundles_post_ra>
